<compile_context>
chip_gen: v7x
topology: tpu7x:2x2x1
jax: 0.10.0
libtpu: 0.0.40
codegen_flags: <defaults>
</compile_context>

<pallas_src>
import math
import functools

import jax
import jax.numpy as jnp
from jax import lax
from jax.experimental import pallas as pl
from jax.experimental.pallas import tpu as pltpu


# ----------------------------------------------------------------------------
# 1) Farthest point sampling (one grid step per graph), lane-dense.
#    pos_ref  : (1, N, 3)  -- only used for the dynamic-slice point fetch
#    post_ref : (1, 3, N)  -- lane-dense copy for the distance / argmax math
#    subpos   : (1, M, 3)
# ----------------------------------------------------------------------------
def fps_kernel(pos_ref, post_ref, subpos_ref, mind_ref):
    n = post_ref.shape[2]
    m = subpos_ref.shape[1]

    pos_t = post_ref[0]                               # (3, N), N on lanes
    px = pos_t[0:1, :]
    py = pos_t[1:2, :]
    pz = pos_t[2:3, :]

    mind_ref[...] = jnp.full((1, n), jnp.inf, jnp.float32)
    col = lax.broadcasted_iota(jnp.int32, (1, n), 1)

    def body(i, idx):
        # Fetch the current farthest point with an indexed load (no one-hot).
        cur = pos_ref[0, pl.ds(idx, 1), :]            # (1, 3)
        # Write the selected point directly (no (M,N) sel scratch / matmul).
        subpos_ref[0, pl.ds(i, 1), :] = cur
        # Squared distance to all points, lane-dense (1, N).
        d = ((px - cur[:, 0:1]) ** 2
             + (py - cur[:, 1:2]) ** 2
             + (pz - cur[:, 2:3]) ** 2)
        mind = jnp.minimum(mind_ref[...], d)
        mind_ref[...] = mind
        # argmax over lanes, smallest-index tie break -> next farthest point.
        maxv = jnp.max(mind)
        return jnp.min(jnp.where(mind == maxv, col, n))

    lax.fori_loop(0, m, body, jnp.int32(0))


def fps_pallas(pos_b, pos_t, m):
    b, n, _ = pos_b.shape
    return pl.pallas_call(
        fps_kernel,
        out_shape=jax.ShapeDtypeStruct((b, m, 3), jnp.float32),
        grid_spec=pltpu.PrefetchScalarGridSpec(
            num_scalar_prefetch=0,
            grid=(b,),
            in_specs=[pl.BlockSpec((1, n, 3), lambda i: (i, 0, 0)),
                      pl.BlockSpec((1, 3, n), lambda i: (i, 0, 0))],
            out_specs=pl.BlockSpec((1, m, 3), lambda i: (i, 0, 0)),
            scratch_shapes=[pltpu.VMEM((1, n), jnp.float32)],
        ),
        compiler_params=pltpu.CompilerParams(
            dimension_semantics=("parallel",)),
    )(pos_b, pos_t)


# ----------------------------------------------------------------------------
# 2) Fused per-graph kernel: shared MLP (Linear -> folded-BN -> ReLU -> Linear)
#    followed by kNN + scatter-max pooling.  Everything for one graph stays in
#    VMEM; bf16 MXU operands, f32 accumulation; dist/acc/features live in
#    scratch refs so nothing large is carried through the k-loop.
# ----------------------------------------------------------------------------
def td_fused_kernel(subpos_ref, post_ref, x_ref, w1_ref, b1_ref, w2_ref,
                    b2_ref, o_ref, feat_ref, dist_ref, acc_ref, *, k):
    m, n = dist_ref.shape

    # ---- shared MLP on all N points of this graph -------------------------
    h = jnp.dot(x_ref[0], w1_ref[...], preferred_element_type=jnp.float32)
    h = jnp.maximum(h + b1_ref[...], 0.0)             # folded BN bias + ReLU
    f = jnp.dot(h.astype(jnp.bfloat16), w2_ref[...],
                preferred_element_type=jnp.float32) + b2_ref[...]
    feat_ref[...] = f.astype(jnp.bfloat16)            # (N, Cout) in VMEM

    # ---- pairwise squared distances cluster->point, kept in VMEM ----------
    sp = subpos_ref[0]                                 # (M, 3)
    pt = post_ref[0]                                   # (3, N)
    dist_ref[...] = ((sp[:, 0:1] - pt[0:1, :]) ** 2
                     + (sp[:, 1:2] - pt[1:2, :]) ** 2
                     + (sp[:, 2:3] - pt[2:3, :]) ** 2)

    acc_ref[...] = jnp.full(acc_ref.shape, -jnp.inf, jnp.float32)
    col = lax.broadcasted_iota(jnp.int32, (m, n), 1)

    def body(j, carry):
        d = dist_ref[...]
        minv = jnp.min(d, axis=-1, keepdims=True)                   # (M, 1)
        idx = jnp.min(jnp.where(d == minv, col, n),
                      axis=-1, keepdims=True)                       # (M, 1)
        hot = (col == idx)                                          # (M, N)
        sel = jnp.dot(hot.astype(jnp.bfloat16), feat_ref[...],
                      preferred_element_type=jnp.float32)           # (M, C)
        acc_ref[...] = jnp.maximum(acc_ref[...], sel)
        dist_ref[...] = jnp.where(hot, jnp.inf, d)
        return carry

    # k is static; unroll so the VPU/XLU argmin overlaps the MXU push.
    lax.fori_loop(0, k, body, 0, unroll=True)

    o_ref[0] = acc_ref[...].astype(o_ref.dtype)


def td_fused_pallas(sub_pos_b, pos_t, x_b, w1f, b1f, w2, b2, *, k):
    b, m, _ = sub_pos_b.shape
    n = pos_t.shape[2]
    cin = x_b.shape[2]
    cout = w2.shape[1]
    return pl.pallas_call(
        functools.partial(td_fused_kernel, k=k),
        out_shape=jax.ShapeDtypeStruct((b, m, cout), jnp.float32),
        grid_spec=pltpu.PrefetchScalarGridSpec(
            num_scalar_prefetch=0,
            grid=(b,),
            in_specs=[
                pl.BlockSpec((1, m, 3), lambda i: (i, 0, 0)),
                pl.BlockSpec((1, 3, n), lambda i: (i, 0, 0)),
                pl.BlockSpec((1, n, cin), lambda i: (i, 0, 0)),
                pl.BlockSpec((cin, cout), lambda i: (0, 0)),
                pl.BlockSpec((1, cout), lambda i: (0, 0)),
                pl.BlockSpec((cout, cout), lambda i: (0, 0)),
                pl.BlockSpec((1, cout), lambda i: (0, 0)),
            ],
            out_specs=pl.BlockSpec((1, m, cout), lambda i: (i, 0, 0)),
            scratch_shapes=[
                pltpu.VMEM((n, cout), jnp.bfloat16),   # MLP features
                pltpu.VMEM((m, n), jnp.float32),       # kNN distances
                pltpu.VMEM((m, cout), jnp.float32),    # max-pool accumulator
            ],
        ),
        compiler_params=pltpu.CompilerParams(
            dimension_semantics=("parallel",),
            vmem_limit_bytes=64 << 20),
    )(sub_pos_b, pos_t, x_b, w1f, b1f, w2, b2)


# ----------------------------------------------------------------------------
# TransitionDown forward
# ----------------------------------------------------------------------------
def transition_down(x, pos, batch, params, *, num_graphs, ratio=0.25, k=16):
    ntot, cin = x.shape
    b = num_graphs
    n = ntot // b
    m = max(1, int(math.ceil(ratio * n)))
    assert m <= n, "fps assumes samples-per-graph <= points-per-graph"
    assert k <= n, "this kernel assumes k <= points-per-graph"

    pos_b = pos.reshape(b, n, 3).astype(jnp.float32)      # (B, N, 3)
    pos_t = jnp.swapaxes(pos_b, 1, 2)                     # (B, 3, N) lane-dense

    # 1) FPS (Pallas) -> sampled positions per graph
    sub_pos_b = fps_pallas(pos_b, pos_t, m)               # (B, M, 3)

    # 2) Fold eval-mode BatchNorm (+ b1) into the first linear on the host.
    inv = params["gamma"] * lax.rsqrt(params["var"] + 1e-5)
    w1f = (params["w1"] * inv).astype(jnp.bfloat16)
    b1f = (params["b1"] - params["mean"]) * inv + params["beta"]
    w2 = params["w2"].astype(jnp.bfloat16)

    # 3) Fused MLP + kNN + scatter-max (Pallas, one kernel, per-graph grid).
    x_b = x.reshape(b, n, cin).astype(jnp.bfloat16)
    out_b = td_fused_pallas(sub_pos_b, pos_t, x_b, w1f, b1f, w2,
                            params["b2"], k=k)            # (B, M, Cout)

    cout = out_b.shape[2]
    out = out_b.reshape(b * m, cout)
    sub_pos = sub_pos_b.reshape(b * m, 3)
    sub_batch = jnp.repeat(jnp.arange(b, dtype=batch.dtype), m)
    return out, sub_pos, sub_batch


def init_params(cin, cout, key):
    k1, k2 = jax.random.split(key)
    s1 = 1.0 / math.sqrt(cin)
    s2 = 1.0 / math.sqrt(cout)
    return dict(
        w1=jax.random.uniform(k1, (cin, cout), jnp.float32, -s1, s1),
        b1=jnp.zeros((1, cout), jnp.float32),
        gamma=jnp.ones((1, cout), jnp.float32),
        beta=jnp.zeros((1, cout), jnp.float32),
        mean=jnp.zeros((1, cout), jnp.float32),
        var=jnp.ones((1, cout), jnp.float32),
        w2=jax.random.uniform(k2, (cout, cout), jnp.float32, -s2, s2),
        b2=jnp.zeros((1, cout), jnp.float32),
    )


if __name__ == "__main__":
    # Small demo consistent with TransitionDown1 of PointNetVAE (128 -> 256).
    B, N, CIN, COUT = 2, 64, 128, 256
    RATIO, K = 0.25, 16

    key = jax.random.PRNGKey(0)
    kx, kp, kw = jax.random.split(key, 3)
    x = jax.random.normal(kx, (B * N, CIN), jnp.float32)
    pos = jax.random.normal(kp, (B * N, 3), jnp.float32)
    batch = jnp.repeat(jnp.arange(B, dtype=jnp.int32), N)
    params = init_params(CIN, COUT, kw)

    out, sub_pos, sub_batch = transition_down(
        x, pos, batch, params, num_graphs=B, ratio=RATIO, k=K)
    jax.block_until_ready((out, sub_pos, sub_batch))

    M = int(math.ceil(RATIO * N))
    assert out.shape == (B * M, COUT)
    assert sub_pos.shape == (B * M, 3)
    assert sub_batch.shape == (B * M,)
    assert bool(jnp.isfinite(out).all())
    assert bool(jnp.isfinite(sub_pos).all())
    print("KERNEL_OK")
</pallas_src>

<mosaic_0001>
module attributes {stable_mosaic.version = 11 : i64} {
  func.func @fps_kernel(%arg0: i32, %arg1: memref<1x64x3xf32, #tpu.memory_space<vmem>>, %arg2: memref<1x3x64xf32, #tpu.memory_space<vmem>>, %arg3: memref<1x16x3xf32, #tpu.memory_space<vmem>>, %arg4: memref<1x64xf32, #tpu.memory_space<vmem>>) attributes {dimension_semantics = [#tpu.dimension_semantics<parallel>], iteration_bounds = array<i64: 2>, scalar_prefetch = 0 : i64, scratch_operands = 1 : i64, tpu.core_type = #tpu.core_type<tc>, window_params = [{transform_indices = @transform_0, window_bounds = array<i64: 1, 64, 3>}, {transform_indices = @transform_1, window_bounds = array<i64: 1, 3, 64>}, {transform_indices = @transform_2, window_bounds = array<i64: 1, 16, 3>}]} {
    %c0 = arith.constant 0 : index
    %c0_0 = arith.constant 0 : index
    %c0_1 = arith.constant 0 : index
    %0 = vector.load %arg2[%c0, %c0_0, %c0_1] : memref<1x3x64xf32, #tpu.memory_space<vmem>>, vector<1x3x64xf32>
    %1 = vector.shape_cast %0 : vector<1x3x64xf32> to vector<3x64xf32>
    %2 = vector.extract_strided_slice %1 {offsets = [0, 0], sizes = [1, 64], strides = [1, 1]} : vector<3x64xf32> to vector<1x64xf32>
    %3 = vector.extract_strided_slice %1 {offsets = [1, 0], sizes = [1, 64], strides = [1, 1]} : vector<3x64xf32> to vector<1x64xf32>
    %4 = vector.extract_strided_slice %1 {offsets = [2, 0], sizes = [1, 64], strides = [1, 1]} : vector<3x64xf32> to vector<1x64xf32>
    %cst = arith.constant 0x7F800000 : f32
    %5 = vector.broadcast %cst : f32 to vector<1x64xf32>
    %c0_2 = arith.constant 0 : index
    %c0_3 = arith.constant 0 : index
    %6 = vector.load %arg4[%c0_2, %c0_3] : memref<1x64xf32, #tpu.memory_space<vmem>>, vector<1x64xf32>
    tpu.vector_store %arg4[%c0_2, %c0_3], %5 {strides = array<i32>} : memref<1x64xf32, #tpu.memory_space<vmem>>, vector<1x64xf32>,
    %7 = tpu.iota {dimensions = array<i32: 1>} : vector<1x64xi32>
    %c0_i32 = arith.constant 0 : i32
    %c0_i32_4 = arith.constant 0 : i32
    %c16_i32 = arith.constant 16 : i32
    %8 = arith.addi %c0_i32_4, %c16_i32 : i32
    %c1_i32 = arith.constant 1 : i32
    %9 = scf.for %arg5 = %c0_i32_4 to %8 step %c1_i32 iter_args(%arg6 = %c0_i32) -> (i32)  : i32 {
      %c0_6 = arith.constant 0 : index
      %10 = arith.index_cast %arg6 : i32 to index
      %c0_7 = arith.constant 0 : index
      %11 = vector.load %arg1[%c0_6, %10, %c0_7] : memref<1x64x3xf32, #tpu.memory_space<vmem>>, vector<1x1x3xf32>
      %12 = vector.shape_cast %11 : vector<1x1x3xf32> to vector<1x3xf32>
      %c0_8 = arith.constant 0 : index
      %13 = arith.index_cast %arg5 : i32 to index
      %c0_9 = arith.constant 0 : index
      %14 = vector.load %arg3[%c0_8, %13, %c0_9] : memref<1x16x3xf32, #tpu.memory_space<vmem>>, vector<1x1x3xf32>
      %15 = vector.shape_cast %14 : vector<1x1x3xf32> to vector<1x3xf32>
      %16 = vector.shape_cast %12 : vector<1x3xf32> to vector<1x1x3xf32>
      tpu.vector_store %arg3[%c0_8, %13, %c0_9], %16 {strides = array<i32>} : memref<1x16x3xf32, #tpu.memory_space<vmem>>, vector<1x1x3xf32>,
      %17 = vector.extract_strided_slice %12 {offsets = [0, 0], sizes = [1, 1], strides = [1, 1]} : vector<1x3xf32> to vector<1x1xf32>
      %18 = vector.broadcast %17 : vector<1x1xf32> to vector<1x64xf32>
      %19 = arith.subf %2, %18 : vector<1x64xf32>
      %20 = arith.mulf %19, %19 : vector<1x64xf32>
      %21 = vector.extract_strided_slice %12 {offsets = [0, 1], sizes = [1, 1], strides = [1, 1]} : vector<1x3xf32> to vector<1x1xf32>
      %22 = vector.broadcast %21 : vector<1x1xf32> to vector<1x64xf32>
      %23 = arith.subf %3, %22 : vector<1x64xf32>
      %24 = arith.mulf %23, %23 : vector<1x64xf32>
      %25 = arith.addf %20, %24 : vector<1x64xf32>
      %26 = vector.extract_strided_slice %12 {offsets = [0, 2], sizes = [1, 1], strides = [1, 1]} : vector<1x3xf32> to vector<1x1xf32>
      %27 = vector.broadcast %26 : vector<1x1xf32> to vector<1x64xf32>
      %28 = arith.subf %4, %27 : vector<1x64xf32>
      %29 = arith.mulf %28, %28 : vector<1x64xf32>
      %30 = arith.addf %25, %29 : vector<1x64xf32>
      %c0_10 = arith.constant 0 : index
      %c0_11 = arith.constant 0 : index
      %31 = vector.load %arg4[%c0_10, %c0_11] : memref<1x64xf32, #tpu.memory_space<vmem>>, vector<1x64xf32>
      %32 = arith.minimumf %31, %30 : vector<1x64xf32>
      %c0_12 = arith.constant 0 : index
      %c0_13 = arith.constant 0 : index
      %33 = vector.load %arg4[%c0_12, %c0_13] : memref<1x64xf32, #tpu.memory_space<vmem>>, vector<1x64xf32>
      tpu.vector_store %arg4[%c0_12, %c0_13], %32 {strides = array<i32>} : memref<1x64xf32, #tpu.memory_space<vmem>>, vector<1x64xf32>,
      %34 = vector.shape_cast %32 : vector<1x64xf32> to vector<1x1x64xf32>
      %cst_14 = arith.constant dense<0xFF800000> : vector<1xf32>
      %35 = vector.multi_reduction <maximumf>, %34, %cst_14 [1, 2] : vector<1x1x64xf32> to vector<1xf32>
      %36 = vector.shape_cast %35 : vector<1xf32> to vector<1x1x1xf32>
      %37 = vector.extract %36[0, 0, 0] : f32 from vector<1x1x1xf32>
      %38 = vector.broadcast %37 : f32 to vector<1x64xf32>
      %39 = arith.cmpf oeq, %32, %38 : vector<1x64xf32>
      %c64_i32 = arith.constant 64 : i32
      %40 = vector.broadcast %c64_i32 : i32 to vector<1x64xi32>
      %41 = arith.select %39, %7, %40 : vector<1x64xi1>, vector<1x64xi32>
      %42 = vector.shape_cast %41 : vector<1x64xi32> to vector<1x1x64xi32>
      %cst_15 = arith.constant dense<2147483647> : vector<1xi32>
      %43 = vector.multi_reduction <minsi>, %42, %cst_15 [1, 2] : vector<1x1x64xi32> to vector<1xi32>
      %44 = vector.shape_cast %43 : vector<1xi32> to vector<1x1x1xi32>
      %45 = vector.extract %44[0, 0, 0] : i32 from vector<1x1x1xi32>
      scf.yield %45 : i32
    }
    %c16_i32_5 = arith.constant 16 : i32
    return
  }
  func.func @transform_0(%arg0: i32) -> (i32, i32, i32) {
    %c0_i32 = arith.constant 0 : i32
    %c0_i32_0 = arith.constant 0 : i32
    %c0_i32_1 = arith.constant 0 : i32
    return %arg0, %c0_i32, %c0_i32_0 : i32, i32, i32
  }
  func.func @transform_1(%arg0: i32) -> (i32, i32, i32) {
    %c0_i32 = arith.constant 0 : i32
    %c0_i32_0 = arith.constant 0 : i32
    %c0_i32_1 = arith.constant 0 : i32
    return %arg0, %c0_i32, %c0_i32_0 : i32, i32, i32
  }
  func.func @transform_2(%arg0: i32) -> (i32, i32, i32) {
    %c0_i32 = arith.constant 0 : i32
    %c0_i32_0 = arith.constant 0 : i32
    %c0_i32_1 = arith.constant 0 : i32
    return %arg0, %c0_i32, %c0_i32_0 : i32, i32, i32
  }
}

</mosaic_0001>

<bundles_post_ra>
// kernel: tpu_custom_call.1
= control target key start
LH: loop header
LB: loop body
LE: loop exit
PB: predicated region body
PF: predicated region fallthrough
CT: control target
= control target key end

     0   :  { %s417_s9 = smov 0   ;;  %s469_s0 = inlined_call_operand.vmem [shape: f32[2,64,3], index: 0, kind: input, shape index: {}]   ;;  %s470_s1 = inlined_call_operand.vmem [shape: f32[2,3,64], index: 1, kind: input, shape index: {}]   ;;  %s471_s2 = inlined_call_operand.vmem [shape: f32[2,16,3], index: 2, kind: output, shape index: {}]  }
   0x1 LB: > { %s325_s10 = sadd.s32 4294967295, %s388_s9   ;;  %p329_p0 = scmp.ge.s32.totalorder %s388_s9, 1  ;;  %s388_s9 = sphi %s417_s9, %s12_s9  }
   0x2   : > { %p121_p1 = scmp.lt.s32.totalorder %s388_s9, 3 }
   0x4   : > { %p122_p2 = pnand %p329_p0, %p121_p1 }
   0x5   : > { %p147_p3 = scmp.lt.s32.totalorder (!%p122_p2), %s325_s10, 1  ;;  %vm162_vm0 = vcmask (!%p122_p2), 516096   ;;  %v164_v0 = vlaneseq (!%p122_p2)  ;;  %v398_v1 = vmov (!%p122_p2), inf   ;;  %s443_s23 = smov (!%p122_p2), 0  }
   0x6   : > { %125 = sbr.rel (%p122_p2) target bundleno = 730 (0x2da), region = 28  ;;  %163 = vst.msk [vmem:[#allocation2] sm:$0x1] (!%p122_p2), %vm162_vm0, %v398_v1  ;;  %s445_s24 = smov (!%p122_p2), 0  }
   0x7   : > { %v426_v2 = vand.u32 (!%p122_p2), 127, %v164_v0 }
   0xd   : > { %s473_s10 = smov (!%p147_p3, %s325_s10), 1 }
   0xe   : > { %s337_s11 = sshll.u32 %s473_s10, 6  ;;  %s332_s12 = sshll.u32 %s473_s10, 2 }
   0xf   : > { %s431_s15 = scalar_lea.vmem %s469_s0, %s337_s11  ;;  %s155_s18 = scalar_lea.vmem %s470_s1, %s332_s12 }
  0x10   : > { %s338_s19 = sshll.u32 %s473_s10, 4  ;;  %v436_v3 = vld [vmem:[%s155_s18] sm:$0x7] }
  0x11   : > { %s441_s22 = scalar_lea.vmem %s471_s2, %s338_s19 }
  0x12 LB: >> { %v399_v4 = vmov 1   ;;  %vm176_vm1 = vcmask 16384   ;;  %v400_v5 = vmov 0   ;;  %s173_s25 = scalar_lea.vmem %s431_s15, %s392_s23  ;;  %s175_s26 = scalar_lea.vmem %s441_s22, %s396_s24  ;;  %v401_v7 = vmov 2   ;;  %v207_v22 = vld [vmem:[#allocation2] sm:$0x1]  ;;  %s396_s24 = sphi %s445_s24, %s171_s24   ;;  %s392_s23 = sphi %s443_s23, %s342_s23  }
  0x13   : >> { %371 = vset.pattern.permute.xlu0 %v399_v4  ;;  %373 = vset.pattern.permute.xlu1 %v400_v5  ;;  %v174_v6 = vld [vmem:[%s173_s25] sm:$0x1]  ;;  %s171_s24 = sadd.s32 1, %s396_s24  }
  0x14   : >> { %186 = vperm.xlu0 %371, %v174_v6   ;;  %177 = vst.msk [vmem:[%s175_s26] sm:$0x1] %vm176_vm1, %v174_v6  ;;  %180 = vperm.xlu1 %373, %v174_v6   ;;  %p168_p4 = scmp.ge.s32.totalorder %s171_s24, 16  }
  0x18   : >> { %372 = vset.pattern.permute.xlu0 %v401_v7 }
  0x19   : >> { %197 = vperm.xlu0 %372, %v174_v6  }
  0x93   : >> { %v187_v8 = vpop.permute.xlu0 %186  ;;  %v181_v10 = vpop.permute.xlu1 %180 }
  0x94   : >> { %v188_v9 = vrot.slane %v187_v8, 7  ;;  %v183_v12 = vsub.f32 %v436_v3, %v181_v10 }
  0x96   : >> { %v190_v11 = vsub.f32 %v436_v3, %v188_v9  ;;  %v184_v17 = vmul.f32 %v183_v12, %v183_v12 }
  0x98   : >> { %v191_v13 = vmul.f32 %v190_v11, %v190_v11  ;;  %v198_v14 = vpop.permute.xlu0 %197 }
  0x99   : >> { %v199_v15 = vrot.slane %v198_v14, 6 }
  0x9a   : >> { %v193_v16 = vrot.slane %v191_v13, 1 }
  0x9b   : >> { %v201_v18 = vsub.f32 %v436_v3, %v199_v15 }
  0x9c   : >> { %v195_v20 = vadd.f32 %v193_v16, %v184_v17 }
  0x9d   : >> { %v202_v19 = vmul.f32 %v201_v18, %v201_v18 }
  0x9f   : >> { %v204_v21 = vrot.slane %v202_v19, 2 }
  0xa1   : >> { %v206_v23 = vadd.f32 %v204_v21, %v195_v20 }
  0xa3   : >> { %v208_v24 = vmin.f32 %v207_v22, %v206_v23 }
  0xa5   : >> { %v210_v25 = vsel %vm162_vm0, %v208_v24, -inf  ;;  %209 = vst.msk [vmem:[#allocation2] sm:$0x1] %vm162_vm0, %v208_v24 }
  0xa6   : >> { %211 = vmax.xlane.f32.xlu1 %v210_v25 }
 0x133   : >> { %v212_v26 = vpop.xlane.xlu1 %211 }
 0x134   : >> { %v213_v27 = vrot.slane %v212_v26, 4 }
 0x136   : >> { %v214_v28 = vmax.f32 %v212_v26, %v213_v27 }
 0x138   : >> { %v215_v29 = vrot.slane %v214_v28, 2 }
 0x13a   : >> { %v216_v30 = vmax.f32 %v214_v28, %v215_v29 }
 0x13c   : >> { %v217_v31 = vrot.slane %v216_v30, 1 }
 0x13e   : >> { %v218_v32 = vmax.f32 %v216_v30, %v217_v31 }
 0x140   : >> { %339 = vpush %v218_v32 }
 0x171   : >> { %s340_s27 = spop %339 }
 0x172   : >> { %v220_v33 = vstv %s340_s27 }
 0x173   : >> { %vm221_vm2 = vcmp.eq.f32.partialorder %v208_v24, %v220_v33 }
 0x174   : >> { %v222_v34 = vsel %vm221_vm2, %v426_v2, 64 }
 0x175   : >> { %v223_v35 = vsel %vm162_vm0, %v222_v34, 2147483647 }
 0x176   : >> { %v225_v36 = vshra.s32 %v223_v35, 16  ;;  %v224_v38 = vand.u32 65535, %v223_v35 }
 0x178   : >> { %v227_v37 = vcvt.s32.f32 %v225_v36  ;;  %v226_v40 = vcvt.s32.f32 %v224_v38 }
 0x17a   : >> { %228 = vmin.xlane.f32.xlu0 %v227_v37 }
 0x207   : >> { %v229_v39 = vpop.xlane.xlu0 %228 }
 0x208   : >> { %vm230_vm3 = vcmp.eq.f32.partialorder %v227_v37, %v229_v39  ;;  %v235_v42 = vcvt.f32.s32 %v229_v39 }
 0x209   : >> { %v231_v41 = vsel %vm230_vm3, %v226_v40, inf }
 0x20a   : >> { %232 = vmin.xlane.f32.xlu1 %v231_v41  ;;  %v236_v44 = vshll.u32 %v235_v42, 16 }
 0x297   : >> { %v233_v43 = vpop.xlane.xlu1 %232 }
 0x298   : >> { %v234_v45 = vcvt.f32.s32 %v233_v43 }
 0x29a   : >> { %v237_v46 = vadd.s32 %v236_v44, %v234_v45 }
 0x29c   : >> { %v238_v47 = vrot.slane %v237_v46, 4 }
 0x29e   : >> { %vm239_vm4 = vcmp.lt.s32.totalorder %v237_v46, %v238_v47 }
 0x29f   : >> { %v240_v48 = vsel %vm239_vm4, %v237_v46, %v238_v47 }
 0x2a0   : >> { %v241_v49 = vrot.slane %v240_v48, 2 }
 0x2a2   : >> { %vm242_vm5 = vcmp.lt.s32.totalorder %v240_v48, %v241_v49 }
 0x2a3   : >> { %v243_v50 = vsel %vm242_vm5, %v240_v48, %v241_v49 }
 0x2a4   : >> { %v244_v51 = vrot.slane %v243_v50, 1 }
 0x2a6   : >> { %vm245_vm6 = vcmp.lt.s32.totalorder %v243_v50, %v244_v51 }
 0x2a7   : >> { %v246_v52 = vsel %vm245_vm6, %v243_v50, %v244_v51 }
 0x2a8   : >> { %341 = vpush %v246_v52 }
 0x2d3   : > { %170 = sbr.rel (!%p168_p4) target bundleno = 18 (0x12), region = 70 }
 0x2d9   : >> { %s342_s23 = spop %341  }
 0x2da PF: > { %s12_s9 = sadd.s32 1, %s388_s9  }
 0x2db   : > { %p9_p5 = scmp.ge.s32.totalorder %s12_s9, 4  }
 0x2dd   :  { %11 = sbr.rel (!%p9_p5) target bundleno = 1 (0x1), region = 81 }

</bundles_post_ra>
